<compile_context>
chip_gen: v5e
topology: v5e:2x2
jax: 0.10.0
libtpu: 0.0.40
codegen_flags: <defaults>
</compile_context>

<pallas_src>
import jax
import jax.numpy as jnp
from jax.experimental import pallas as pl
from jax.experimental.pallas import tpu as pltpu


_LN_EPS = 1e-5  # F.layer_norm default eps


def _round_up(x, m):
    return ((x + m - 1) // m) * m


def _erf_f32(x):
    """erf via Abramowitz & Stegun 7.1.26 (max abs err ~1.5e-7).

    Uses only exp / mul / add / select so it lowers cleanly in Mosaic
    (exact lax.erf may not have a TPU Pallas lowering on all generations).
    """
    a1, a2, a3, a4, a5 = (0.254829592, -0.284496736, 1.421413741,
                          -1.453152027, 1.061405429)
    p = 0.3275911
    ax = jnp.abs(x)
    t = 1.0 / (1.0 + p * ax)
    poly = t * (a1 + t * (a2 + t * (a3 + t * (a4 + t * a5))))
    y = 1.0 - poly * jnp.exp(-ax * ax)
    return jnp.where(x >= 0.0, y, -y)


def _gelu_exact(x):
    """Exact (erf-form) GELU, matching torch.nn.GELU() default."""
    return 0.5 * x * (1.0 + _erf_f32(x * 0.7071067811865476))


def _ff_kernel(x_ref, g_ref, beta_ref, w1_ref, b1_ref, w2_ref, b2_ref, o_ref):
    """One row tile: out = gelu_exact(LN(x) @ W1 + b1) @ W2 + b2."""
    x = x_ref[...].astype(jnp.float32)                       # (T, D)

    # --- LayerNorm over last dim (biased variance, eps=1e-5), f32 math.
    mean = jnp.mean(x, axis=-1, keepdims=True)
    xc = x - mean
    var = jnp.mean(xc * xc, axis=-1, keepdims=True)
    xn = xc * jax.lax.rsqrt(var + _LN_EPS)
    xn = xn * g_ref[...] + beta_ref[...]                     # (1, D) broadcasts

    # --- Linear(D -> H): bf16 MXU operands, f32 accumulation; exact GELU in f32.
    h = jnp.dot(xn.astype(jnp.bfloat16), w1_ref[...],
                preferred_element_type=jnp.float32) + b1_ref[...]
    h = _gelu_exact(h)

    # --- Linear(H -> D): bf16 MXU operands, f32 accumulation.
    out = jnp.dot(h.astype(jnp.bfloat16), w2_ref[...],
                  preferred_element_type=jnp.float32) + b2_ref[...]

    # Dropout(p=0.0) / cond_fn=None are identities.
    o_ref[...] = out.astype(o_ref.dtype)


def feed_forward(x, gamma, beta, w1, b1, w2, b2, *, tile_n=1024):
    """Fused FeedForward forward.

    x:     (..., D) float32 tokens.
    gamma: (D,)  LayerNorm scale.    beta: (D,) LayerNorm shift (zeros buffer).
    w1:    (D, H), b1: (H,)          -- first Linear  (weight stored input-major).
    w2:    (H, D), b2: (D,)          -- second Linear (weight stored input-major).
    """
    D = x.shape[-1]
    H = w1.shape[1]
    x2 = x.reshape(-1, D)
    N = x2.shape[0]

    # Row-tile selection: large tiles amortize per-grid-step overhead, but keep
    # the pipeline footprint inside a budget that fits every TPU generation's
    # scoped VMEM (conservative 48 MiB; v7x physical is 64 MiB).
    def vmem_need(t):
        return (2 * t * D * 4              # input tiles (double-buffered, f32)
                + 2 * t * D * 4            # output tiles (double-buffered, f32)
                + 2 * (D * H + H * D) * 2  # bf16 weights (double-buffered worst case)
                + 2 * t * H * 4            # hidden-activation headroom (f32)
                + 2 * (3 * D + H) * 4)     # gamma / beta / b1 / b2

    tile = _round_up(max(8, min(tile_n, N)), 8)
    budget = 48 * 1024 * 1024
    while vmem_need(tile) > budget and tile > 8:
        tile = max(8, _round_up(tile // 2, 8))

    n_pad = _round_up(N, tile)
    if n_pad != N:
        x2 = jnp.pad(x2, ((0, n_pad - N), (0, 0)))

    gamma2 = gamma.reshape(1, D).astype(jnp.float32)
    beta2 = beta.reshape(1, D).astype(jnp.float32)
    w1b = w1.astype(jnp.bfloat16)
    w2b = w2.astype(jnp.bfloat16)
    b1_2 = b1.reshape(1, H).astype(jnp.float32)
    b2_2 = b2.reshape(1, D).astype(jnp.float32)

    vmem_limit = int(min(max(2 * vmem_need(tile), 16 * 1024 * 1024),
                         60 * 1024 * 1024))

    out = pl.pallas_call(
        _ff_kernel,
        out_shape=jax.ShapeDtypeStruct((n_pad, D), x.dtype),
        grid_spec=pltpu.PrefetchScalarGridSpec(
            num_scalar_prefetch=0,
            grid=(n_pad // tile,),
            in_specs=[
                pl.BlockSpec((tile, D), lambda i: (i, 0)),   # x row tile
                pl.BlockSpec((1, D), lambda i: (0, 0)),      # gamma (grid-invariant)
                pl.BlockSpec((1, D), lambda i: (0, 0)),      # beta  (grid-invariant)
                pl.BlockSpec((D, H), lambda i: (0, 0)),      # W1 bf16 (grid-invariant)
                pl.BlockSpec((1, H), lambda i: (0, 0)),      # b1
                pl.BlockSpec((H, D), lambda i: (0, 0)),      # W2 bf16 (grid-invariant)
                pl.BlockSpec((1, D), lambda i: (0, 0)),      # b2
            ],
            out_specs=pl.BlockSpec((tile, D), lambda i: (i, 0)),
        ),
        compiler_params=pltpu.CompilerParams(
            dimension_semantics=("parallel",),   # shards rows across v7x's 2 TCs
            vmem_limit_bytes=vmem_limit,
        ),
    )(x2, gamma2, beta2, w1b, b1_2, w2b, b2_2)

    if n_pad != N:
        out = out[:N]
    return out.reshape(x.shape)


def _reference(x, gamma, beta, w1, b1, w2, b2):
    """Plain-JAX reference of the same forward (same bf16 matmul precision)."""
    xf = x.astype(jnp.float32)
    mean = jnp.mean(xf, axis=-1, keepdims=True)
    xc = xf - mean
    var = jnp.mean(xc * xc, axis=-1, keepdims=True)
    xn = xc * jax.lax.rsqrt(var + _LN_EPS) * gamma + beta
    h = jnp.dot(xn.astype(jnp.bfloat16), w1.astype(jnp.bfloat16),
                preferred_element_type=jnp.float32) + b1
    h = jax.nn.gelu(h, approximate=False)   # exact erf GELU (torch default)
    out = jnp.dot(h.astype(jnp.bfloat16), w2.astype(jnp.bfloat16),
                  preferred_element_type=jnp.float32) + b2
    return out.astype(x.dtype)


if __name__ == "__main__":
    key = jax.random.PRNGKey(0)
    kx, kg, kw1, kb1, kw2, kb2 = jax.random.split(key, 6)

    # Small demo shapes consistent with FeedForward on a token sequence.
    # dim=128 keeps the channel (lane) axis dense -> unmasked stores & full MXU use.
    B, S, D, MULT = 2, 8, 128, 4
    H = D * MULT

    x = jax.random.normal(kx, (B, S, D), dtype=jnp.float32)
    gamma = 1.0 + 0.1 * jax.random.normal(kg, (D,), dtype=jnp.float32)
    beta = jnp.zeros((D,), dtype=jnp.float32)            # zeros buffer in the module
    w1 = jax.random.normal(kw1, (D, H), dtype=jnp.float32) * (1.0 / D) ** 0.5
    b1 = jax.random.normal(kb1, (H,), dtype=jnp.float32) * 0.05
    w2 = jax.random.normal(kw2, (H, D), dtype=jnp.float32) * (1.0 / H) ** 0.5
    b2 = jax.random.normal(kb2, (D,), dtype=jnp.float32) * 0.05

    out = feed_forward(x, gamma, beta, w1, b1, w2, b2)
    out = jax.block_until_ready(out)

    ref = _reference(x, gamma, beta, w1, b1, w2, b2)
    assert out.shape == x.shape
    assert jnp.allclose(out, ref, atol=2e-2, rtol=2e-2), "mismatch vs reference"

    print("KERNEL_OK")
</pallas_src>

<mosaic_0001>
module attributes {stable_mosaic.version = 11 : i64} {
  func.func @_ff_kernel(%arg0: i32, %arg1: memref<16x128xf32, #tpu.memory_space<vmem>>, %arg2: memref<1x128xf32, #tpu.memory_space<vmem>>, %arg3: memref<1x128xf32, #tpu.memory_space<vmem>>, %arg4: memref<128x512xbf16, #tpu.memory_space<vmem>>, %arg5: memref<1x512xf32, #tpu.memory_space<vmem>>, %arg6: memref<512x128xbf16, #tpu.memory_space<vmem>>, %arg7: memref<1x128xf32, #tpu.memory_space<vmem>>, %arg8: memref<16x128xf32, #tpu.memory_space<vmem>>) attributes {dimension_semantics = [#tpu.dimension_semantics<parallel>], iteration_bounds = array<i64: 1>, scalar_prefetch = 0 : i64, scratch_operands = 0 : i64, tpu.core_type = #tpu.core_type<tc>, window_params = [{transform_indices = @transform_0, window_bounds = array<i64: 16, 128>}, {pipeline_mode = #tpu.pipeline_mode<synchronous>, transform_indices = @transform_1, window_bounds = array<i64: 1, 128>}, {pipeline_mode = #tpu.pipeline_mode<synchronous>, transform_indices = @transform_2, window_bounds = array<i64: 1, 128>}, {pipeline_mode = #tpu.pipeline_mode<synchronous>, transform_indices = @transform_3, window_bounds = array<i64: 128, 512>}, {pipeline_mode = #tpu.pipeline_mode<synchronous>, transform_indices = @transform_4, window_bounds = array<i64: 1, 512>}, {pipeline_mode = #tpu.pipeline_mode<synchronous>, transform_indices = @transform_5, window_bounds = array<i64: 512, 128>}, {pipeline_mode = #tpu.pipeline_mode<synchronous>, transform_indices = @transform_6, window_bounds = array<i64: 1, 128>}, {transform_indices = @transform_7, window_bounds = array<i64: 16, 128>}]} {
    %c0 = arith.constant 0 : index
    %c0_0 = arith.constant 0 : index
    %0 = vector.load %arg1[%c0, %c0_0] : memref<16x128xf32, #tpu.memory_space<vmem>>, vector<16x128xf32>
    %cst = arith.constant dense<0.000000e+00> : vector<16xf32>
    %1 = vector.multi_reduction <add>, %0, %cst [1] : vector<16x128xf32> to vector<16xf32>
    %2 = vector.shape_cast %1 : vector<16xf32> to vector<16x1xf32>
    %cst_1 = arith.constant 1.280000e+02 : f32
    %3 = vector.broadcast %cst_1 : f32 to vector<16x1xf32>
    %4 = arith.divf %2, %3 : vector<16x1xf32>
    %5 = vector.broadcast %4 : vector<16x1xf32> to vector<16x128xf32>
    %6 = arith.subf %0, %5 : vector<16x128xf32>
    %7 = arith.mulf %6, %6 : vector<16x128xf32>
    %cst_2 = arith.constant dense<0.000000e+00> : vector<16xf32>
    %8 = vector.multi_reduction <add>, %7, %cst_2 [1] : vector<16x128xf32> to vector<16xf32>
    %9 = vector.shape_cast %8 : vector<16xf32> to vector<16x1xf32>
    %cst_3 = arith.constant 1.280000e+02 : f32
    %10 = vector.broadcast %cst_3 : f32 to vector<16x1xf32>
    %11 = arith.divf %9, %10 : vector<16x1xf32>
    %cst_4 = arith.constant 9.99999974E-6 : f32
    %12 = vector.broadcast %cst_4 : f32 to vector<16x1xf32>
    %13 = arith.addf %11, %12 : vector<16x1xf32>
    %14 = math.rsqrt %13 : vector<16x1xf32>
    %15 = vector.broadcast %14 : vector<16x1xf32> to vector<16x128xf32>
    %16 = arith.mulf %6, %15 : vector<16x128xf32>
    %c0_5 = arith.constant 0 : index
    %c0_6 = arith.constant 0 : index
    %17 = vector.load %arg2[%c0_5, %c0_6] : memref<1x128xf32, #tpu.memory_space<vmem>>, vector<1x128xf32>
    %18 = vector.broadcast %17 : vector<1x128xf32> to vector<16x128xf32>
    %19 = arith.mulf %16, %18 : vector<16x128xf32>
    %c0_7 = arith.constant 0 : index
    %c0_8 = arith.constant 0 : index
    %20 = vector.load %arg3[%c0_7, %c0_8] : memref<1x128xf32, #tpu.memory_space<vmem>>, vector<1x128xf32>
    %21 = vector.broadcast %20 : vector<1x128xf32> to vector<16x128xf32>
    %22 = arith.addf %19, %21 : vector<16x128xf32>
    %23 = arith.truncf %22 : vector<16x128xf32> to vector<16x128xbf16>
    %c0_9 = arith.constant 0 : index
    %c0_10 = arith.constant 0 : index
    %24 = vector.load %arg4[%c0_9, %c0_10] : memref<128x512xbf16, #tpu.memory_space<vmem>>, vector<128x512xbf16>
    %cst_11 = arith.constant dense<0.000000e+00> : vector<16x512xf32>
    %25 = tpu.matmul %23, %24, %cst_11 {dimension_numbers = #tpu.dot_dimension_numbers<[1], [0], [0], [1], [0, 0, 1, 1], [], []>} : vector<16x128xbf16>, vector<128x512xbf16>, vector<16x512xf32> -> vector<16x512xf32>
    %c0_12 = arith.constant 0 : index
    %c0_13 = arith.constant 0 : index
    %26 = vector.load %arg5[%c0_12, %c0_13] : memref<1x512xf32, #tpu.memory_space<vmem>>, vector<1x512xf32>
    %27 = vector.broadcast %26 : vector<1x512xf32> to vector<16x512xf32>
    %28 = arith.addf %25, %27 : vector<16x512xf32>
    %cst_14 = arith.constant 5.000000e-01 : f32
    %29 = vector.broadcast %cst_14 : f32 to vector<16x512xf32>
    %30 = arith.mulf %29, %28 : vector<16x512xf32>
    %cst_15 = arith.constant 0.707106769 : f32
    %31 = vector.broadcast %cst_15 : f32 to vector<16x512xf32>
    %32 = arith.mulf %28, %31 : vector<16x512xf32>
    %33 = math.absf %32 : vector<16x512xf32>
    %cst_16 = arith.constant 0.327591091 : f32
    %34 = vector.broadcast %cst_16 : f32 to vector<16x512xf32>
    %35 = arith.mulf %34, %33 : vector<16x512xf32>
    %cst_17 = arith.constant 1.000000e+00 : f32
    %36 = vector.broadcast %cst_17 : f32 to vector<16x512xf32>
    %37 = arith.addf %36, %35 : vector<16x512xf32>
    %cst_18 = arith.constant 1.000000e+00 : f32
    %38 = vector.broadcast %cst_18 : f32 to vector<16x512xf32>
    %39 = arith.divf %38, %37 : vector<16x512xf32>
    %cst_19 = arith.constant 1.06140542 : f32
    %40 = vector.broadcast %cst_19 : f32 to vector<16x512xf32>
    %41 = arith.mulf %39, %40 : vector<16x512xf32>
    %cst_20 = arith.constant -1.45315206 : f32
    %42 = vector.broadcast %cst_20 : f32 to vector<16x512xf32>
    %43 = arith.addf %42, %41 : vector<16x512xf32>
    %44 = arith.mulf %39, %43 : vector<16x512xf32>
    %cst_21 = arith.constant 1.42141378 : f32
    %45 = vector.broadcast %cst_21 : f32 to vector<16x512xf32>
    %46 = arith.addf %45, %44 : vector<16x512xf32>
    %47 = arith.mulf %39, %46 : vector<16x512xf32>
    %cst_22 = arith.constant -0.284496725 : f32
    %48 = vector.broadcast %cst_22 : f32 to vector<16x512xf32>
    %49 = arith.addf %48, %47 : vector<16x512xf32>
    %50 = arith.mulf %39, %49 : vector<16x512xf32>
    %cst_23 = arith.constant 0.254829586 : f32
    %51 = vector.broadcast %cst_23 : f32 to vector<16x512xf32>
    %52 = arith.addf %51, %50 : vector<16x512xf32>
    %53 = arith.mulf %39, %52 : vector<16x512xf32>
    %cst_24 = arith.constant 0.000000e+00 : f32
    %54 = vector.broadcast %cst_24 : f32 to vector<16x512xf32>
    %55 = arith.subf %54, %33 : vector<16x512xf32>
    %56 = arith.mulf %55, %33 : vector<16x512xf32>
    %57 = math.exp %56 : vector<16x512xf32>
    %58 = arith.mulf %53, %57 : vector<16x512xf32>
    %cst_25 = arith.constant 1.000000e+00 : f32
    %59 = vector.broadcast %cst_25 : f32 to vector<16x512xf32>
    %60 = arith.subf %59, %58 : vector<16x512xf32>
    %cst_26 = arith.constant 0.000000e+00 : f32
    %61 = vector.broadcast %cst_26 : f32 to vector<16x512xf32>
    %62 = arith.cmpf oge, %32, %61 : vector<16x512xf32>
    %cst_27 = arith.constant 0.000000e+00 : f32
    %63 = vector.broadcast %cst_27 : f32 to vector<16x512xf32>
    %64 = arith.subf %63, %60 : vector<16x512xf32>
    %65 = arith.select %62, %60, %64 : vector<16x512xi1>, vector<16x512xf32>
    %cst_28 = arith.constant 1.000000e+00 : f32
    %66 = vector.broadcast %cst_28 : f32 to vector<16x512xf32>
    %67 = arith.addf %66, %65 : vector<16x512xf32>
    %68 = arith.mulf %30, %67 : vector<16x512xf32>
    %69 = arith.truncf %68 : vector<16x512xf32> to vector<16x512xbf16>
    %c0_29 = arith.constant 0 : index
    %c0_30 = arith.constant 0 : index
    %70 = vector.load %arg6[%c0_29, %c0_30] : memref<512x128xbf16, #tpu.memory_space<vmem>>, vector<512x128xbf16>
    %cst_31 = arith.constant dense<0.000000e+00> : vector<16x128xf32>
    %71 = tpu.matmul %69, %70, %cst_31 {dimension_numbers = #tpu.dot_dimension_numbers<[1], [0], [0], [1], [0, 0, 1, 1], [], []>} : vector<16x512xbf16>, vector<512x128xbf16>, vector<16x128xf32> -> vector<16x128xf32>
    %c0_32 = arith.constant 0 : index
    %c0_33 = arith.constant 0 : index
    %72 = vector.load %arg7[%c0_32, %c0_33] : memref<1x128xf32, #tpu.memory_space<vmem>>, vector<1x128xf32>
    %73 = vector.broadcast %72 : vector<1x128xf32> to vector<16x128xf32>
    %74 = arith.addf %71, %73 : vector<16x128xf32>
    %c0_34 = arith.constant 0 : index
    %c0_35 = arith.constant 0 : index
    %75 = vector.load %arg8[%c0_34, %c0_35] : memref<16x128xf32, #tpu.memory_space<vmem>>, vector<16x128xf32>
    tpu.vector_store %arg8[%c0_34, %c0_35], %74 {strides = array<i32>} : memref<16x128xf32, #tpu.memory_space<vmem>>, vector<16x128xf32>,
    return
  }
  func.func @transform_0(%arg0: i32) -> (i32, i32) {
    %c0_i32 = arith.constant 0 : i32
    %c0_i32_0 = arith.constant 0 : i32
    return %arg0, %c0_i32 : i32, i32
  }
  func.func @transform_1(%arg0: i32) -> (i32, i32) {
    %c0_i32 = arith.constant 0 : i32
    %c0_i32_0 = arith.constant 0 : i32
    %c0_i32_1 = arith.constant 0 : i32
    return %c0_i32, %c0_i32_0 : i32, i32
  }
  func.func @transform_2(%arg0: i32) -> (i32, i32) {
    %c0_i32 = arith.constant 0 : i32
    %c0_i32_0 = arith.constant 0 : i32
    %c0_i32_1 = arith.constant 0 : i32
    return %c0_i32, %c0_i32_0 : i32, i32
  }
  func.func @transform_3(%arg0: i32) -> (i32, i32) {
    %c0_i32 = arith.constant 0 : i32
    %c0_i32_0 = arith.constant 0 : i32
    %c0_i32_1 = arith.constant 0 : i32
    return %c0_i32, %c0_i32_0 : i32, i32
  }
  func.func @transform_4(%arg0: i32) -> (i32, i32) {
    %c0_i32 = arith.constant 0 : i32
    %c0_i32_0 = arith.constant 0 : i32
    %c0_i32_1 = arith.constant 0 : i32
    return %c0_i32, %c0_i32_0 : i32, i32
  }
  func.func @transform_5(%arg0: i32) -> (i32, i32) {
    %c0_i32 = arith.constant 0 : i32
    %c0_i32_0 = arith.constant 0 : i32
    %c0_i32_1 = arith.constant 0 : i32
    return %c0_i32, %c0_i32_0 : i32, i32
  }
  func.func @transform_6(%arg0: i32) -> (i32, i32) {
    %c0_i32 = arith.constant 0 : i32
    %c0_i32_0 = arith.constant 0 : i32
    %c0_i32_1 = arith.constant 0 : i32
    return %c0_i32, %c0_i32_0 : i32, i32
  }
  func.func @transform_7(%arg0: i32) -> (i32, i32) {
    %c0_i32 = arith.constant 0 : i32
    %c0_i32_0 = arith.constant 0 : i32
    return %arg0, %c0_i32 : i32, i32
  }
}

</mosaic_0001>

<bundles_post_ra>
// kernel: tpu_custom_call.1
= control target key start
LH: loop header
LB: loop body
LE: loop exit
PB: predicated region body
PF: predicated region fallthrough
CT: control target
= control target key end

     0   :  { %12 = vsyncpa [#allocation3], 0  ;;  %s1960_s0 = inlined_call_operand.hbm [shape: f32[16,128], index: 0, kind: input, shape index: {}]   ;;  %s1961_s1 = inlined_call_operand.hbm [shape: f32[1,128], index: 1, kind: input, shape index: {}]   ;;  %s1962_s2 = inlined_call_operand.vmem [shape: f32[1,128], index: 2, kind: input, shape index: {}]   ;;  %s1963_s3 = inlined_call_operand.hbm [shape: bf16[128,512], index: 3, kind: input, shape index: {}]   ;;  %s1964_s4 = inlined_call_operand.hbm [shape: f32[1,512], index: 4, kind: input, shape index: {}]   ;;  %s1965_s5 = inlined_call_operand.hbm [shape: bf16[512,128], index: 5, kind: input, shape index: {}]   ;;  %s1966_s6 = inlined_call_operand.vmem [shape: f32[1,128], index: 6, kind: input, shape index: {}]   ;;  %s1967_s7 = inlined_call_operand.hbm [shape: f32[16,128], index: 7, kind: output, shape index: {}]  }
   0x1   :  { %13 = vsyncpa [#allocation6], 0 }
   0x2   :  { %14 = vsyncpa [#allocation9], 0  ;;  %s34_s26 = sshll.u32 %s1961_s1, 4  ;;  %s35_s26 = int_to_ptr.hbm [resolvable:$true] %s34_s26 }
   0x3   :  { %15 = vsyncpa [#allocation4], 0  ;;  %s1610_s27 = smov [#allocation5]   ;;  %s60_s8 = sshll.u32 %s1964_s4, 4  ;;  %s61_s8 = int_to_ptr.hbm [resolvable:$true] %s60_s8 }
   0x4   :  { %s36_s28 = sshll.u32 %s1610_s27, 4  ;;  %s1611_s9 = smov [#allocation8]   ;;  %s37_s28 = int_to_ptr.vmem [resolvable:$true] %s36_s28 }
   0x5   :  { %39 = dma.hbm_to_vmem [thread:$0]  %s35_s26, 16, %s37_s28, [#allocation6]  }
   0x6   :  { %s62_s10 = sshll.u32 %s1611_s9, 4  ;;  %s20_s13 = sshll.u32 %s1960_s0, 4  ;;  %s63_s10 = int_to_ptr.vmem [resolvable:$true] %s62_s10  ;;  %s21_s13 = int_to_ptr.hbm [resolvable:$true] %s20_s13 }
   0x7   :  { %65 = dma.hbm_to_vmem [thread:$0]  %s61_s8, 64, %s63_s10, [#allocation9]  }
   0x8   :  { %s1612_s1 = smov [#allocation2]   ;;  %s46_s17 = sshll.u32 %s1963_s3, 4  ;;  %s47_s17 = int_to_ptr.hbm [resolvable:$true] %s46_s17 }
   0x9   :  { %s22_s14 = sshll.u32 %s1612_s1, 4  ;;  %s1613_s18 = smov 128   ;;  %s23_s14 = int_to_ptr.vmem [resolvable:$true] %s22_s14 }
   0xa   :  { %s1614_s4 = smov 8   ;;  %s1615_s19 = smov [#allocation7]  }
   0xb   :  { %28 = dma.hbm_to_vmem [thread:$0]  %s21_s13, 256, %s23_s14, [#allocation3], %s1613_s18, %s1613_s18, %s1614_s4  }
   0xc   :  { %s48_s20 = sshll.u32 %s1615_s19, 4  ;;  %s1616_s0 = smov 256   ;;  %s49_s20 = int_to_ptr.vmem [resolvable:$true] %s48_s20 }
   0xd   :  { %s1617_s21 = smov 16   ;;  %s70_s24 = sshll.u32 %s1965_s5, 4  ;;  %s71_s24 = int_to_ptr.hbm [resolvable:$true] %s70_s24 }
   0xe   :  { %54 = dma.hbm_to_vmem [thread:$0]  %s47_s17, 4096, %s49_s20, [#allocation6], %s1616_s0, %s1616_s0, %s1617_s21  }
   0xf   :  { %s1618_s25 = smov [#allocation10]   ;;  %s1619_s26 = smov 64  }
  0x10   :  { %s72_s3 = sshll.u32 %s1618_s25, 4  ;;  %s1620_s27 = smov 4   ;;  %s73_s3 = int_to_ptr.vmem [resolvable:$true] %s72_s3 }
  0x11   :  { %78 = dma.hbm_to_vmem [thread:$0]  %s71_s24, 4096, %s73_s3, [#allocation9], %s1619_s26, %s1619_s26, %s1620_s27  }
  0x12   :  { %1602 = dma.done.wait [#allocation3], 256  }
  0x13   :  { %1603 = vsyncadd [#allocation3], 4294967040 }
  0x14   :  { %1604 = dma.done.wait [#allocation6], 4112  }
  0x15   :  { %1605 = vsyncadd [#allocation6], 4294963184 }
  0x16   :  { %1606 = dma.done.wait [#allocation9], 4160  }
  0x17   :  { %1607 = vsyncadd [#allocation9], 4294963136  ;;  %v101_v0 = vld [vmem:[#allocation2] sm:$0xff]  ;;  %v102_v1 = vld [vmem:[#allocation2 + $0x8] sm:$0xff]  ;;  %v1621_v2 = vmov 128.0   ;;  %s1622_s30 = smov [#allocation11]  }
  0x18   :  { %103 = vadd.xlane.f32.xlu0 %v101_v0  ;;  %1420 = vrcp.f32 %v1621_v2  ;;  %v1198_v17 = vld [vmem:[#allocation7 + $0xe0] sm:$0xf]  ;;  %v1370_v18 = vld [vmem:[#allocation7 + $0xec] sm:$0xf0]  ;;  %v1368_v19 = vld [vmem:[#allocation7 + $0xe4] sm:$0xf] }
  0x19   :  { %v1199_v20 = vor.u32 %v1370_v18, %v1198_v17  ;;  %v1200_v21 = vld [vmem:[#allocation7 + $0xf0] sm:$0xf0]  ;;  %v1206_v22 = vld [vmem:[#allocation7 + $0xe8] sm:$0xf]  ;;  %v1371_v23 = vld [vmem:[#allocation7 + $0xf4] sm:$0xf0] }
  0x1a   :  { %v1203_v24 = vor.u32 %v1368_v19, %v1200_v21  ;;  %v1207_v25 = vor.u32 %v1371_v23, %v1206_v22  ;;  %v1369_v26 = vld [vmem:[#allocation7 + $0xec] sm:$0xf]  ;;  %v1208_v27 = vld [vmem:[#allocation7 + $0xf8] sm:$0xf0]  ;;  %v1182_v29 = vld [vmem:[#allocation7 + $0xc0] sm:$0xf] }
  0x1b   :  { %365 = vmatpush.bf16.msra.mxu0 %v1199_v20  ;;  %v1211_v28 = vor.u32 %v1369_v26, %v1208_v27  ;;  %v1366_v30 = vld [vmem:[#allocation7 + $0xcc] sm:$0xf0]  ;;  %v1364_v31 = vld [vmem:[#allocation7 + $0xc4] sm:$0xf]  ;;  %v1184_v33 = vld [vmem:[#allocation7 + $0xd0] sm:$0xf0] }
  0x1c   :  { %379 = vmatpush.bf16.msra.mxu1 %v1203_v24  ;;  %393 = vmatpush.bf16.msra.mxu2 %v1207_v25  ;;  %v1183_v32 = vor.u32 %v1366_v30, %v1182_v29  ;;  %v1190_v34 = vld [vmem:[#allocation7 + $0xc8] sm:$0xf]  ;;  %v1367_v35 = vld [vmem:[#allocation7 + $0xd4] sm:$0xf0]  ;;  %v1187_v36 = vor.u32 %v1364_v31, %v1184_v33  ;;  %v1365_v38 = vld [vmem:[#allocation7 + $0xcc] sm:$0xf] }
  0x1d   :  { %407 = vmatpush.bf16.msra.mxu3 %v1211_v28  ;;  %v1191_v37 = vor.u32 %v1367_v35, %v1190_v34  ;;  %v1192_v39 = vld [vmem:[#allocation7 + $0xd8] sm:$0xf0]  ;;  %v1166_v41 = vld [vmem:[#allocation7 + $0xa0] sm:$0xf]  ;;  %v1362_v42 = vld [vmem:[#allocation7 + $0xac] sm:$0xf0] }
  0x1e   :  { %v1421_v3 = vpop.eup %1420  ;;  %v1195_v40 = vor.u32 %v1365_v38, %v1192_v39  ;;  %v1360_v43 = vld [vmem:[#allocation7 + $0xa4] sm:$0xf]  ;;  %v1167_v44 = vor.u32 %v1362_v42, %v1166_v41  ;;  %v1168_v45 = vld [vmem:[#allocation7 + $0xb0] sm:$0xf0]  ;;  %v1174_v46 = vld [vmem:[#allocation7 + $0xa8] sm:$0xf] }
  0x1f   :  { %v108_v4 = vmul.f32 128.0, %v1421_v3  ;;  %vm112_vm0 = vweird.f32 %v1421_v3  ;;  %366 = vmatpush.bf16.msra.mxu0 %v1183_v32  ;;  %v1363_v47 = vld [vmem:[#allocation7 + $0xb4] sm:$0xf0]  ;;  %v1171_v48 = vor.u32 %v1360_v43, %v1168_v45  ;;  %v1361_v50 = vld [vmem:[#allocation7 + $0xac] sm:$0xf]  ;;  %s1067_s8 = sshll.u32 %s1622_s30, 4  ;;  %s1068_s8 = int_to_ptr.vmem [resolvable:$true] %s1067_s8 }
  0x20   :  { %105 = vadd.xlane.f32.xlu0 %v102_v1  ;;  %380 = vmatpush.bf16.msra.mxu1 %v1187_v36  ;;  %v1175_v49 = vor.u32 %v1363_v47, %v1174_v46  ;;  %v1176_v51 = vld [vmem:[#allocation7 + $0xb8] sm:$0xf0]  ;;  %v1150_v53 = vld [vmem:[#allocation7 + $0x80] sm:$0xf]  ;;  %v1358_v54 = vld [vmem:[#allocation7 + $0x8c] sm:$0xf0] }
  0x21   :  { %v109_v5 = vsub.f32 1.0, %v108_v4  ;;  %394 = vmatpush.bf16.msra.mxu2 %v1191_v37  ;;  %408 = vmatpush.bf16.msra.mxu3 %v1195_v40  ;;  %v1179_v52 = vor.u32 %v1361_v50, %v1176_v51  ;;  %v1356_v55 = vld [vmem:[#allocation7 + $0x84] sm:$0xf]  ;;  %v1151_v56 = vor.u32 %v1358_v54, %v1150_v53  ;;  %v1152_v57 = vld [vmem:[#allocation7 + $0x90] sm:$0xf0] }
  0x22   :  { %v1158_v58 = vld [vmem:[#allocation7 + $0x88] sm:$0xf]  ;;  %v1359_v59 = vld [vmem:[#allocation7 + $0x94] sm:$0xf0]  ;;  %v1155_v60 = vor.u32 %v1356_v55, %v1152_v57  ;;  %v1357_v62 = vld [vmem:[#allocation7 + $0x8c] sm:$0xf] }
  0x23   :  { %v110_v6 = vmul.f32 %v1421_v3, %v109_v5  ;;  %367 = vmatpush.bf16.msra.mxu0 %v1167_v44  ;;  %v1159_v61 = vor.u32 %v1359_v59, %v1158_v58  ;;  %v1160_v63 = vld [vmem:[#allocation7 + $0x98] sm:$0xf0]  ;;  %v1354_v2 = vld [vmem:[#allocation7 + $0x6c] sm:$0xf0]  ;;  %v1136_v5 = vld [vmem:[#allocation7 + $0x70] sm:$0xf0] }
  0x24   :  { %381 = vmatpush.bf16.msra.mxu1 %v1171_v48  ;;  %v1350_v17 = vld [vmem:[#allocation7 + $0x4c] sm:$0xf0]  ;;  %v1348_v18 = vld [vmem:[#allocation7 + $0x44] sm:$0xf]  ;;  %v1120_v20 = vld [vmem:[#allocation7 + $0x50] sm:$0xf0] }
  0x25   :  { %v111_v7 = vadd.f32 %v1421_v3, %v110_v6  ;;  %395 = vmatpush.bf16.msra.mxu2 %v1175_v49  ;;  %409 = vmatpush.bf16.msra.mxu3 %v1179_v52  ;;  %v1142_v6 = vld [vmem:[#allocation7 + $0x68] sm:$0xf]  ;;  %v1351_v22 = vld [vmem:[#allocation7 + $0x54] sm:$0xf0]  ;;  %v1123_v23 = vor.u32 %v1348_v18, %v1120_v20  ;;  %v1349_v25 = vld [vmem:[#allocation7 + $0x4c] sm:$0xf] }
  0x26   :  { %v1126_v21 = vld [vmem:[#allocation7 + $0x48] sm:$0xf]  ;;  %v1128_v26 = vld [vmem:[#allocation7 + $0x58] sm:$0xf0]  ;;  %v1102_v28 = vld [vmem:[#allocation7 + $0x20] sm:$0xf] }
  0x27   :  { %v1681_v8 = vsel %vm112_vm0, %v1421_v3, %v111_v7  ;;  %368 = vmatpush.bf16.msra.mxu0 %v1151_v56  ;;  %v1352_v3 = vld [vmem:[#allocation7 + $0x64] sm:$0xf]  ;;  %v1355_v7 = vld [vmem:[#allocation7 + $0x74] sm:$0xf0]  ;;  %v1127_v24 = vor.u32 %v1351_v22, %v1126_v21  ;;  %v1131_v27 = vor.u32 %v1349_v25, %v1128_v26  ;;  %v1346_v29 = vld [vmem:[#allocation7 + $0x2c] sm:$0xf0] }
  0x28   :  { %382 = vmatpush.bf16.msra.mxu1 %v1155_v60  ;;  %v1344_v30 = vld [vmem:[#allocation7 + $0x24] sm:$0xf]  ;;  %v1103_v31 = vor.u32 %v1346_v29, %v1102_v28  ;;  %v1104_v32 = vld [vmem:[#allocation7 + $0x30] sm:$0xf0]  ;;  %v1110_v33 = vld [vmem:[#allocation7 + $0x28] sm:$0xf] }
  0x29   :  { %396 = vmatpush.bf16.msra.mxu2 %v1159_v61  ;;  %v1347_v34 = vld [vmem:[#allocation7 + $0x34] sm:$0xf0]  ;;  %v1107_v35 = vor.u32 %v1344_v30, %v1104_v32  ;;  %v1345_v37 = vld [vmem:[#allocation7 + $0x2c] sm:$0xf]  ;;  %v1112_v38 = vld [vmem:[#allocation7 + $0x38] sm:$0xf0] }
  0x2a   :  { %v1111_v36 = vor.u32 %v1347_v34, %v1110_v33  ;;  %v1086_v39 = vld [vmem:[#allocation7] sm:$0xf]  ;;  %v1115_v41 = vor.u32 %v1345_v37, %v1112_v38  ;;  %v1342_v42 = vld [vmem:[#allocation7 + $0xc] sm:$0xf0]  ;;  %v1340_v43 = vld [vmem:[#allocation7 + $0x4] sm:$0xf] }
  0x2b   :  { %v1088_v44 = vld [vmem:[#allocation7 + $0x10] sm:$0xf0]  ;;  %v1087_v46 = vor.u32 %v1342_v42, %v1086_v39  ;;  %v1094_v48 = vld [vmem:[#allocation7 + $0x8] sm:$0xf]  ;;  %v1343_v49 = vld [vmem:[#allocation7 + $0x14] sm:$0xf0] }
  0x2c   :  { %v1091_v47 = vor.u32 %v1340_v43, %v1088_v44  ;;  %v1341_v50 = vld [vmem:[#allocation7 + $0xc] sm:$0xf]  ;;  %v1095_v51 = vor.u32 %v1343_v49, %v1094_v48  ;;  %v1096_v52 = vld [vmem:[#allocation7 + $0x18] sm:$0xf0] }
  0x2d   :  { %v1099_v54 = vor.u32 %v1341_v50, %v1096_v52 }
  0x8b   :  { %v104_v9 = vpop.xlane.xlu0 %103 }
  0x8c   :  { %v114_v10 = vmul.f32 %v1681_v8, %v104_v9  ;;  %v1139_v9 = vor.u32 %v1352_v3, %v1136_v5 }
  0x8e   :  { %v1684_v11 = vsub.f32 %v101_v0, %v114_v10  ;;  %v1163_v0 = vor.u32 %v1357_v62, %v1160_v63  ;;  %v1143_v10 = vor.u32 %v1355_v7, %v1142_v6  ;;  %383 = vmatpush.bf16.msra.mxu1 %v1139_v9  ;;  %v1417_v6 = vld [vmem:[#allocation5] ss:$0 sm:$0xff] }
  0x90   :  { %v118_v12 = vmul.f32 %v1684_v11, %v1684_v11  ;;  %410 = vmatpush.bf16.msra.mxu3 %v1163_v0  ;;  %397 = vmatpush.bf16.msra.mxu2 %v1143_v10 }
  0x92   :  { %120 = vadd.xlane.f32.xlu1 %v118_v12  ;;  %v1353_v12 = vld [vmem:[#allocation7 + $0x6c] sm:$0xf]  ;;  %384 = vmatpush.bf16.msra.mxu1 %v1123_v23 }
  0x93   :  { %v106_v13 = vpop.xlane.xlu0 %105 }
  0x94   :  { %v115_v14 = vmul.f32 %v1681_v8, %v106_v13  ;;  %v1144_v13 = vld [vmem:[#allocation7 + $0x78] sm:$0xf0]  ;;  %398 = vmatpush.bf16.msra.mxu2 %v1127_v24 }
  0x96   :  { %v1689_v15 = vsub.f32 %v102_v1, %v115_v14  ;;  %v1134_v1 = vld [vmem:[#allocation7 + $0x60] sm:$0xf]  ;;  %v1147_v14 = vor.u32 %v1353_v12, %v1144_v13  ;;  %385 = vmatpush.bf16.msra.mxu1 %v1107_v35  ;;  %v1418_v13 = vld [vmem:[%s1962_s2] ss:$0 sm:$0xff] }
  0x97   :  { %v1135_v4 = vor.u32 %v1354_v2, %v1134_v1 }
  0x98   :  { %v119_v16 = vmul.f32 %v1689_v15, %v1689_v15  ;;  %411 = vmatpush.bf16.msra.mxu3 %v1147_v14  ;;  %399 = vmatpush.bf16.msra.mxu2 %v1111_v36 }
  0x99   :  { %369 = vmatpush.bf16.msra.mxu0 %v1135_v4 }
  0x9a   :  { %122 = vadd.xlane.f32.xlu1 %v119_v16  ;;  %v1118_v16 = vld [vmem:[#allocation7 + $0x40] sm:$0xf]  ;;  %386 = vmatpush.bf16.msra.mxu1 %v1091_v47 }
  0x9b   :  { %v1119_v19 = vor.u32 %v1350_v17, %v1118_v16 }
  0x9c   :  { %412 = vmatpush.bf16.msra.mxu3 %v1131_v27  ;;  %400 = vmatpush.bf16.msra.mxu2 %v1095_v51 }
  0x9d   :  { %370 = vmatpush.bf16.msra.mxu0 %v1119_v19 }
  0xa0   :  { %413 = vmatpush.bf16.msra.mxu3 %v1115_v41 }
  0xa1   :  { %371 = vmatpush.bf16.msra.mxu0 %v1103_v31 }
  0xa4   :  { %414 = vmatpush.bf16.msra.mxu3 %v1099_v54 }
  0xa5   :  { %372 = vmatpush.bf16.msra.mxu0 %v1087_v46 }
 0x105   :  { %v121_v40 = vpop.xlane.xlu1 %120 }
 0x106   :  { %v124_v45 = vmul.f32 %v121_v40, %v1681_v8 }
 0x108   :  { %v126_v53 = vadd.f32 1e-05, %v124_v45 }
 0x10a   :  { %1422 = vrsqrt.f32 %v126_v53  ;;  %vm134_vm2 = vweird.f32 %v126_v53 }
 0x10d   :  { %v123_v55 = vpop.xlane.xlu1 %122 }
 0x10e   :  { %v125_v56 = vmul.f32 %v123_v55, %v1681_v8 }
 0x110   :  { %v1423_v57 = vpop.eup %1422  ;;  %v127_v58 = vadd.f32 1e-05, %v125_v56 }
 0x111   :  { %v129_v59 = vmul.f32 %v1423_v57, %v126_v53  ;;  %vm135_vm1 = vweird.f32 %v1423_v57 }
 0x112   :  { %1424 = vrsqrt.f32 %v127_v58  ;;  %vm136_vm3 = vmor %vm134_vm2, %vm135_vm1  ;;  %vm144_vm5 = vweird.f32 %v127_v58 }
 0x113   :  { %v130_v60 = vmul.f32 %v1423_v57, %v129_v59 }
 0x115   :  { %v131_v61 = vmul.f32 0.5, %v130_v60 }
 0x117   :  { %v132_v62 = vsub.f32 1.5, %v131_v61 }
 0x118   :  { %v1425_v63 = vpop.eup %1424 }
 0x119   :  { %v133_v0 = vmul.f32 %v1423_v57, %v132_v62  ;;  %v139_v1 = vmul.f32 %v1425_v63, %v127_v58  ;;  %vm145_vm4 = vweird.f32 %v1425_v63 }
 0x11a   :  { %vm146_vm6 = vmor %vm144_vm5, %vm145_vm4 }
 0x11b   :  { %v140_v2 = vmul.f32 %v1425_v63, %v139_v1  ;;  %v137_v3 = vsel %vm136_vm3, %v1423_v57, %v133_v0 }
 0x11c   :  { %v148_v8 = vmul.f32 %v137_v3, %v1684_v11  ;;  %v1700_v11 = vld [vmem:[#allocation8] sm:$0xf] }
 0x11d   :  { %v141_v4 = vmul.f32 0.5, %v140_v2  ;;  %v197_v19 = vperm.slane %v1700_v11, 0  ;;  %v198_v20 = vperm.slane %v1700_v11, 1  ;;  %v199_v26 = vperm.slane %v1700_v11, 2 }
 0x11e   :  { %v154_v12 = vmul.f32 %v1417_v6, %v148_v8  ;;  %v200_v27 = vperm.slane %v1700_v11, 3 }
 0x11f   :  { %v142_v5 = vsub.f32 1.5, %v141_v4 }
 0x120   :  { %v160_v16 = vadd.f32 %v1418_v13, %v154_v12 }
 0x121   :  { %v143_v7 = vmul.f32 %v1425_v63, %v142_v5 }
 0x123   :  { %v147_v9 = vsel %vm146_vm6, %v1425_v63, %v143_v7 }
 0x124   :  { %v149_v10 = vmul.f32 %v147_v9, %v1689_v15 }
 0x126   :  { %v155_v14 = vmul.f32 %v1417_v6, %v149_v10 }
 0x128   :  { %v161_v17 = vadd.f32 %v1418_v13, %v155_v14 }
 0x12a   :  { %v162_v18 = vpack.c.bf16 %v161_v17, %v160_v16 }
 0x12c   :  { %373 = vmatmul.bf16.vlgmr.msra.gmra.mxu0 %v162_v18  ;;  %387 = vmatmul.bf16.vlgmr.msra.gmra.mxu1 %v162_v18 }
 0x12d   :  { %401 = vmatmul.bf16.vlgmr.msra.gmra.mxu2 %v162_v18  ;;  %415 = vmatmul.bf16.vlgmr.msra.gmra.mxu3 %v162_v18 }
 0x1a9   :  { %v374_v15 = vpop.f32.mrf.mxu0  ;;  %v388_v21 = vpop.f32.mrf.mxu1 }
 0x1aa   :  { %v1704_v22 = vadd.f32 %v374_v15, %v197_v19  ;;  %v1706_v23 = vadd.f32 %v388_v21, %v198_v20 }
 0x1ac   :  { %v1709_v24 = vmul.f32 0.70710677, %v1704_v22  ;;  %v1712_v25 = vmul.f32 0.70710677, %v1706_v23 }
 0x1ae   :  { %v1717_v28 = vand.u32 2147483647, %v1709_v24  ;;  %v1720_v29 = vand.u32 2147483647, %v1712_v25 }
 0x1b0   :  { %v445_v30 = vmul.f32 0.3275911, %v1717_v28  ;;  %v446_v31 = vmul.f32 0.3275911, %v1720_v29  ;;  %v402_v32 = vpop.f32.mrf.mxu2  ;;  %v416_v33 = vpop.f32.mrf.mxu3 }
 0x1b1   :  { %v1726_v34 = vadd.f32 %v402_v32, %v199_v26  ;;  %v1730_v35 = vadd.f32 %v416_v33, %v200_v27  ;;  %v376_v48 = vpop.f32.mrf.mxu0  ;;  %v390_v51 = vpop.f32.mrf.mxu1  ;;  %v653_v32 = vsub.f32 0.0, %v1717_v28 }
 0x1b2   :  { %v453_v36 = vadd.f32 1.0, %v445_v30  ;;  %v454_v37 = vadd.f32 1.0, %v446_v31  ;;  %v1752_v56 = vadd.f32 %v376_v48, %v197_v19  ;;  %v1754_v59 = vadd.f32 %v390_v51, %v198_v20 }
 0x1b3   :  { %v1733_v38 = vmul.f32 0.70710677, %v1726_v34  ;;  %v1736_v39 = vmul.f32 0.70710677, %v1730_v35  ;;  %v661_v51 = vmul.f32 %v653_v32, %v1717_v28 }
 0x1b4   :  { %1426 = vrcp.f32 %v453_v36  ;;  %v470_v53 = vand.u32 2147483647, %v453_v36  ;;  %v472_v54 = vand.u32 2147483648, %v453_v36  ;;  %v487_v58 = vand.u32 2147483648, %v454_v37 }
 0x1b5   :  { %1428 = vrcp.f32 %v454_v37  ;;  %v1739_v40 = vand.u32 2147483647, %v1733_v38  ;;  %v1742_v41 = vand.u32 2147483647, %v1736_v39  ;;  %v485_v61 = vand.u32 2147483647, %v454_v37 }
 0x1b6   :  { %vm466_vm9 = vweird.f32 %v453_v36  ;;  %v473_v63 = vor.u32 1.1754944e-38, %v472_v54  ;;  %vm481_vm11 = vweird.f32 %v454_v37  ;;  %v1757_v1 = vmul.f32 0.70710677, %v1752_v56 }
 0x1b7   :  { %v447_v42 = vmul.f32 0.3275911, %v1739_v40  ;;  %v448_v44 = vmul.f32 0.3275911, %v1742_v41  ;;  %vm471_vm12 = vcmp.eq.f32.partialorder %v470_v53, 8.507059e+37  ;;  %v488_v4 = vor.u32 1.1754944e-38, %v487_v58 }
 0x1b8   :  { %v1760_v5 = vmul.f32 0.70710677, %v1754_v59  ;;  %vm486_vm14 = vcmp.eq.f32.partialorder %v485_v61, 8.507059e+37  ;;  %v1774_v17 = vand.u32 2147483647, %v1757_v1 }
 0x1b9   :  { %v1746_v47 = vadd.f32 1.0, %v447_v42  ;;  %v1748_v50 = vadd.f32 1.0, %v448_v44  ;;  %v669_v61 = vmul.f32 1.442695, %v661_v51 }
 0x1ba   :  { %v1427_v43 = vpop.eup %1426  ;;  %v1777_v20 = vand.u32 2147483647, %v1760_v5  ;;  %v449_v30 = vmul.f32 0.3275911, %v1774_v17 }
 0x1bb   :  { %v1429_v45 = vpop.eup %1428  ;;  %v462_v46 = vmul.f32 %v1427_v43, %v453_v36  ;;  %1430 = vrcp.f32 %v1746_v47  ;;  %vm467_vm7 = vweird.f32 %v1427_v43  ;;  %v502_v42 = vand.u32 2147483648, %v1746_v47 }
 0x1bc   :  { %v477_v49 = vmul.f32 %v1429_v45, %v454_v37  ;;  %1432 = vrcp.f32 %v1748_v50  ;;  %vm482_vm8 = vweird.f32 %v1429_v45  ;;  %vm468_vm10 = vmor %vm466_vm9, %vm467_vm7  ;;  %v450_v33 = vmul.f32 0.3275911, %v1777_v20 }
 0x1bd   :  { %v463_v52 = vsub.f32 1.0, %v462_v46  ;;  %vm483_vm13 = vmor %vm481_vm11, %vm482_vm8  ;;  %v500_v37 = vand.u32 2147483647, %v1746_v47  ;;  %vm496_vm0 = vweird.f32 %v1746_v47  ;;  %v503_v53 = vor.u32 1.1754944e-38, %v502_v42 }
 0x1be   :  { %v478_v55 = vsub.f32 1.0, %v477_v49  ;;  %v1790_v46 = vadd.f32 1.0, %v450_v33  ;;  %v654_v49 = vsub.f32 0.0, %v1720_v29  ;;  %vm511_vm4 = vweird.f32 %v1748_v50 }
 0x1bf   :  { %v464_v57 = vmul.f32 %v1427_v43, %v463_v52  ;;  %vm501_vm2 = vcmp.eq.f32.partialorder %v500_v37, 8.507059e+37  ;;  %v515_v28 = vand.u32 2147483647, %v1748_v50 }
 0x1c0   :  { %v479_v60 = vmul.f32 %v1429_v45, %v478_v55  ;;  %v547_v42 = vand.u32 2147483648, %v1790_v46 }
 0x1c1   :  { %v465_v62 = vadd.f32 %v1427_v43, %v464_v57  ;;  %v1431_v2 = vpop.eup %1430  ;;  %v662_v57 = vmul.f32 %v654_v49, %v1720_v29  ;;  %vm516_vm6 = vcmp.eq.f32.partialorder %v515_v28, 8.507059e+37  ;;  %v1379_v49 = vld [vmem:[#allocation10 + $0x38] sm:$0xff] }
 0x1c2   :  { %v480_v0 = vadd.f32 %v1429_v45, %v479_v60  ;;  %v1762_v8 = vpop.eup %1432  ;;  %v492_v9 = vmul.f32 %v1431_v2, %v1746_v47  ;;  %vm497_vm15 = vweird.f32 %v1431_v2  ;;  %v517_v60 = vand.u32 2147483648, %v1748_v50  ;;  %1005 = vmatpush.bf16.msrb.mxu0 %v1379_v49  ;;  %v1402_v49 = vld [vmem:[#allocation10 + $0xf0] sm:$0xff] }
 0x1c3   :  { %v469_v3 = vsel %vm468_vm10, %v1427_v43, %v465_v62  ;;  %v507_v13 = vmul.f32 %v1762_v8, %v1748_v50  ;;  %v1785_v43 = vadd.f32 1.0, %v449_v30  ;;  %vm498_vm1 = vmor %vm496_vm0, %vm497_vm15  ;;  %vm512_vm3 = vweird.f32 %v1762_v8  ;;  %v404_v62 = vpop.f32.mrf.mxu2 }
 0x1c4   :  { %v1764_v6 = vsel %vm471_vm12, %v473_v63, %v469_v3  ;;  %v484_v7 = vsel %vm483_vm13, %v1429_v45, %v480_v0  ;;  %v493_v16 = vsub.f32 1.0, %v492_v9  ;;  %vm513_vm5 = vmor %vm511_vm4, %vm512_vm3  ;;  %v518_v9 = vor.u32 1.1754944e-38, %v517_v60 }
 0x1c5   :  { %v581_v10 = vmul.f32 1.0614054, %v1764_v6  ;;  %v1768_v12 = vsel %vm486_vm14, %v488_v4, %v484_v7  ;;  %v508_v19 = vsub.f32 1.0, %v507_v13  ;;  %1434 = vrcp.f32 %v1785_v43 }
 0x1c6   :  { %v582_v14 = vmul.f32 1.0614054, %v1768_v12  ;;  %v494_v21 = vmul.f32 %v1431_v2, %v493_v16  ;;  %1436 = vrcp.f32 %v1790_v46  ;;  %v671_v7 = vmul.f32 1.442695, %v662_v57 }
 0x1c7   :  { %v589_v18 = vadd.f32 -1.4531521, %v581_v10  ;;  %v509_v45 = vmul.f32 %v1762_v8, %v508_v19  ;;  %v1811_v10 = vadd.f32 %v404_v62, %v199_v26  ;;  %1438 = vpow2.f32 %v669_v61 }
 0x1c8   :  { %v590_v15 = vadd.f32 -1.4531521, %v582_v14  ;;  %v495_v36 = vadd.f32 %v1431_v2, %v494_v21  ;;  %v532_v14 = vand.u32 2147483648, %v1785_v43  ;;  %vm526_vm8 = vweird.f32 %v1785_v43 }
 0x1c9   :  { %v597_v31 = vmul.f32 %v589_v18, %v1764_v6  ;;  %v510_v55 = vadd.f32 %v1762_v8, %v509_v45  ;;  %v530_v18 = vand.u32 2147483647, %v1785_v43  ;;  %v1822_v32 = vmul.f32 0.70710677, %v1811_v10 }
 0x1ca   :  { %v598_v44 = vmul.f32 %v590_v15, %v1768_v12  ;;  %v499_v52 = vsel %vm498_vm1, %v1431_v2, %v495_v36  ;;  %v533_v37 = vor.u32 1.1754944e-38, %v532_v14  ;;  %v545_v45 = vand.u32 2147483647, %v1790_v46 }
 0x1cb   :  { %v605_v48 = vadd.f32 1.4214138, %v597_v31  ;;  %v1800_v58 = vsel %vm501_vm2, %v503_v53, %v499_v52  ;;  %v1435_v63 = vpop.eup %1434  ;;  %v514_v3 = vsel %vm513_vm5, %v1762_v8, %v510_v55  ;;  %v657_v8 = vsub.f32 0.0, %v1774_v17 }
 0x1cc   :  { %v606_v54 = vadd.f32 1.4214138, %v598_v44  ;;  %v583_v2 = vmul.f32 1.0614054, %v1800_v58  ;;  %v522_v29 = vmul.f32 %v1435_v63, %v1785_v43  ;;  %v1437_v13 = vpop.eup %1436  ;;  %v1814_v16 = vsel %vm516_vm6, %v518_v9, %v514_v3  ;;  %v1387_v43 = vld [vmem:[#allocation10 + $0x78] sm:$0xff]  ;;  %v1386_v3 = vld [vmem:[#allocation10 + $0x70] sm:$0xff] }
 0x1cd   :  { %v613_v47 = vmul.f32 %v605_v48, %v1764_v6  ;;  %v537_v19 = vmul.f32 %v1437_v13, %v1790_v46  ;;  %vm527_vm7 = vweird.f32 %v1435_v63  ;;  %v584_v33 = vmul.f32 1.0614054, %v1814_v16  ;;  %v1439_v51 = vpop.eup %1438  ;;  %1019 = vmatpush.bf16.msrb.mxu1 %v1387_v43 }
 0x1ce   :  { %v614_v0 = vmul.f32 %v606_v54, %v1768_v12  ;;  %v523_v50 = vsub.f32 1.0, %v522_v29  ;;  %v591_v21 = vadd.f32 -1.4531521, %v583_v2  ;;  %vm528_vm9 = vmor %vm526_vm8, %vm527_vm7  ;;  %vm542_vm10 = vweird.f32 %v1437_v13  ;;  %v1378_v2 = vld [vmem:[#allocation10 + $0x30] sm:$0xff] }
 0x1cf   :  { %v621_v4 = vadd.f32 -0.28449672, %v613_v47  ;;  %v538_v31 = vsub.f32 1.0, %v537_v19  ;;  %v1828_v48 = vand.u32 2147483647, %v1822_v32  ;;  %vm531_vm11 = vcmp.eq.f32.partialorder %v530_v18, 8.507059e+37  ;;  %1006 = vmatpush.bf16.msrb.mxu0 %v1378_v2 }
 0x1d0   :  { %v622_v15 = vadd.f32 -0.28449672, %v614_v0  ;;  %v524_v30 = vmul.f32 %v1435_v63, %v523_v50  ;;  %v599_v53 = vmul.f32 %v591_v21, %v1800_v58  ;;  %vm541_vm12 = vweird.f32 %v1790_v46  ;;  %v418_v50 = vpop.f32.mrf.mxu3  ;;  %v1393_v2 = vld [vmem:[#allocation10 + $0xa8] sm:$0xff] }
 0x1d1   :  { %v629_v26 = vmul.f32 %v621_v4, %v1764_v6  ;;  %v539_v44 = vmul.f32 %v1437_v13, %v538_v31  ;;  %v655_v60 = vsub.f32 0.0, %v1739_v40  ;;  %vm543_vm13 = vmor %vm541_vm12, %vm542_vm10  ;;  %v548_v28 = vor.u32 1.1754944e-38, %v547_v42  ;;  %1020 = vmatpush.bf16.msrb.mxu1 %v1386_v3  ;;  %v1401_v3 = vld [vmem:[#allocation10 + $0xe8] sm:$0xff] }
 0x1d2   :  { %v525_v36 = vadd.f32 %v1435_v63, %v524_v30  ;;  %v630_v52 = vmul.f32 %v622_v15, %v1768_v12  ;;  %v451_v62 = vmul.f32 0.3275911, %v1828_v48  ;;  %1440 = vpow2.f32 %v671_v7  ;;  %v1395_v7 = vld [vmem:[#allocation10 + $0xb8] sm:$0xff] }
 0x1d3   :  { %v637_v55 = vadd.f32 0.2548296, %v629_v26  ;;  %v540_v57 = vadd.f32 %v1437_v13, %v539_v44  ;;  %vm546_vm14 = vcmp.eq.f32.partialorder %v545_v45, 8.507059e+37  ;;  %v658_v0 = vsub.f32 0.0, %v1777_v20  ;;  %1033 = vmatpush.bf16.msrb.mxu2 %v1395_v7 }
 0x1d4   :  { %v529_v54 = vsel %vm528_vm9, %v1435_v63, %v525_v36  ;;  %v638_v29 = vadd.f32 0.2548296, %v630_v52  ;;  %v607_v46 = vadd.f32 1.4214138, %v599_v53  ;;  %v665_v18 = vmul.f32 %v657_v8, %v1774_v17  ;;  %v1377_v17 = vld [vmem:[#allocation10 + $0x28] sm:$0xff] }
 0x1d5   :  { %v1832_v47 = vsel %vm531_vm11, %v533_v37, %v529_v54  ;;  %v544_v63 = vsel %vm543_vm13, %v1437_v13, %v540_v57  ;;  %v645_v14 = vmul.f32 %v637_v55, %v1764_v6  ;;  %v1845_v15 = vadd.f32 1.0, %v451_v62  ;;  %v1403_v13 = vld [vmem:[#allocation10 + $0xf8] sm:$0xff]  ;;  %v1385_v8 = vld [vmem:[#allocation10 + $0x68] sm:$0xff]  ;;  %1007 = vmatpush.bf16.msrb.mxu0 %v1377_v17 }
 0x1d6   :  { %v585_v61 = vmul.f32 1.0614054, %v1832_v47  ;;  %v1840_v9 = vsel %vm546_vm14, %v548_v28, %v544_v63  ;;  %v663_v21 = vmul.f32 %v655_v60, %v1739_v40  ;;  %v592_v30 = vadd.f32 -1.4531521, %v584_v33  ;;  %1047 = vmatpush.bf16.msrb.mxu3 %v1403_v13  ;;  %1021 = vmatpush.bf16.msrb.mxu1 %v1385_v8 }
 0x1d7   :  { %v586_v19 = vmul.f32 1.0614054, %v1840_v9  ;;  %v666_v36 = vmul.f32 %v658_v0, %v1777_v20  ;;  %1442 = vrcp.f32 %v1845_v15  ;;  %v1853_v6 = vadd.f32 %v418_v50, %v200_v27  ;;  %v1394_v27 = vld [vmem:[#allocation10 + $0xb0] sm:$0xff] }
 0x1d8   :  { %v593_v4 = vadd.f32 -1.4531521, %v585_v61  ;;  %v646_v37 = vmul.f32 %v638_v29, %v1768_v12  ;;  %v615_v40 = vmul.f32 %v607_v46, %v1800_v58  ;;  %v1441_v42 = vpop.eup %1440  ;;  %v1858_v44 = vmul.f32 0.5, %v1704_v22  ;;  %1034 = vmatpush.bf16.msrb.mxu2 %v1394_v27  ;;  %v1384_v61 = vld [vmem:[#allocation10 + $0x60] sm:$0xff] }
 0x1d9   :  { %v594_v31 = vadd.f32 -1.4531521, %v586_v19  ;;  %v1860_v20 = vmul.f32 %v1439_v51, %v645_v14  ;;  %v677_v45 = vmul.f32 1.442695, %v665_v18  ;;  %v1864_v43 = vmul.f32 0.5, %v1706_v23  ;;  %v1376_v23 = vld [vmem:[#allocation10 + $0x20] sm:$0xff] }
 0x1da   :  { %v601_v26 = vmul.f32 %v593_v4, %v1832_v47  ;;  %v673_v12 = vmul.f32 1.442695, %v663_v21  ;;  %v600_v52 = vmul.f32 %v592_v30, %v1814_v16  ;;  %v679_v22 = vmul.f32 1.442695, %v666_v36  ;;  %1048 = vmatpush.bf16.msrb.mxu3 %v1402_v49  ;;  %1008 = vmatpush.bf16.msrb.mxu0 %v1376_v23  ;;  %v1375_v19 = vld [vmem:[#allocation10 + $0x18] sm:$0xff] }
 0x1db   :  { %v602_v11 = vmul.f32 %v594_v31, %v1840_v9  ;;  %v1869_v51 = vmul.f32 0.70710677, %v1853_v6  ;;  %vm701_vm15 = vcmp.ge.f32.partialorder %v1709_v24, 0.0  ;;  %v1872_v55 = vmul.f32 %v1441_v42, %v646_v37  ;;  %1022 = vmatpush.bf16.msrb.mxu1 %v1384_v61  ;;  %v1392_v37 = vld [vmem:[#allocation10 + $0xa0] sm:$0xff]  ;;  %v1391_v61 = vld [vmem:[#allocation10 + $0x98] sm:$0xff] }
 0x1dc   :  { %v609_v33 = vadd.f32 1.4214138, %v601_v26  ;;  %v623_v57 = vadd.f32 -0.28449672, %v615_v40  ;;  %v693_v62 = vsub.f32 1.0, %v1860_v20  ;;  %1444 = vpow2.f32 %v677_v45  ;;  %1035 = vmatpush.bf16.msrb.mxu2 %v1393_v2  ;;  %v1383_v26 = vld [vmem:[#allocation10 + $0x58] sm:$0xff] }
 0x1dd   :  { %v610_v54 = vadd.f32 1.4214138, %v602_v11  ;;  %v1874_v28 = vpop.eup %1442  ;;  %v1879_v0 = vand.u32 2147483647, %v1869_v51  ;;  %1446 = vpow2.f32 %v673_v12  ;;  %v608_v29 = vadd.f32 1.4214138, %v600_v52 }
 0x1de   :  { %v617_v53 = vmul.f32 %v609_v33, %v1832_v47  ;;  %v552_v4 = vmul.f32 %v1874_v28, %v1845_v15  ;;  %vm702_vm0 = vcmp.ge.f32.partialorder %v1712_v25, 0.0  ;;  %v656_v50 = vsub.f32 0.0, %v1742_v41  ;;  %1049 = vmatpush.bf16.msrb.mxu3 %v1401_v3  ;;  %v1400_v40 = vld [vmem:[#allocation10 + $0xe0] sm:$0xff]  ;;  %1009 = vmatpush.bf16.msrb.mxu0 %v1375_v19  ;;  %v1382_v12 = vld [vmem:[#allocation10 + $0x50] sm:$0xff] }
 0x1df   :  { %v618_v63 = vmul.f32 %v610_v54, %v1840_v9  ;;  %1448 = vpow2.f32 %v679_v22  ;;  %v452_v18 = vmul.f32 0.3275911, %v1879_v0  ;;  %v694_v7 = vsub.f32 1.0, %v1872_v55  ;;  %1023 = vmatpush.bf16.msrb.mxu1 %v1383_v26 }
 0x1e0   :  { %v625_v60 = vadd.f32 -0.28449672, %v617_v53  ;;  %v631_v13 = vmul.f32 %v623_v57, %v1800_v58  ;;  %v553_v30 = vsub.f32 1.0, %v552_v4  ;;  %v709_v31 = vsub.f32 0.0, %v693_v62  ;;  %1036 = vmatpush.bf16.msrb.mxu2 %v1392_v37 }
 0x1e1   :  { %v626_v14 = vadd.f32 -0.28449672, %v618_v63  ;;  %v562_v17 = vand.u32 2147483648, %v1845_v15  ;;  %v1891_v8 = vadd.f32 1.0, %v452_v18  ;;  %vm557_vm1 = vweird.f32 %v1874_v28  ;;  %v1399_v63 = vld [vmem:[#allocation10 + $0xd8] sm:$0xff] }
 0x1e2   :  { %v633_v46 = vmul.f32 %v625_v60, %v1832_v47  ;;  %v554_v42 = vmul.f32 %v1874_v28, %v553_v30  ;;  %v560_v20 = vand.u32 2147483647, %v1845_v15  ;;  %v1445_v45 = vpop.eup %1444  ;;  %v616_v11 = vmul.f32 %v608_v29, %v1814_v16  ;;  %1050 = vmatpush.bf16.msrb.mxu3 %v1400_v40  ;;  %v1398_v30 = vld [vmem:[#allocation10 + $0xd0] sm:$0xff]  ;;  %v1380_v40 = vld [vmem:[#allocation10 + $0x40] sm:$0xff] }
 0x1e3   :  { %v634_v36 = vmul.f32 %v626_v14, %v1840_v9  ;;  %v1899_v27 = vmul.f32 %v656_v50, %v1742_v41  ;;  %1450 = vrcp.f32 %v1891_v8  ;;  %v1902_v52 = vpop.eup %1446  ;;  %v710_v53 = vsub.f32 0.0, %v694_v7  ;;  %1024 = vmatpush.bf16.msrb.mxu1 %v1382_v12  ;;  %v1397_v12 = vld [vmem:[#allocation10 + $0xc8] sm:$0xff] }
 0x1e4   :  { %v641_v21 = vadd.f32 0.2548296, %v633_v46  ;;  %v555_v22 = vadd.f32 %v1874_v28, %v554_v42  ;;  %vm556_vm2 = vweird.f32 %v1845_v15  ;;  %v717_v41 = vsel %vm701_vm15, %v693_v62, %v709_v31  ;;  %1037 = vmatpush.bf16.msrb.mxu2 %v1391_v61  ;;  %v1381_v46 = vld [vmem:[#allocation10 + $0x48] sm:$0xff] }
 0x1e5   :  { %v642_v49 = vadd.f32 0.2548296, %v634_v36  ;;  %v1449_v55 = vpop.eup %1448  ;;  %v425_v57 = vmul.f32 0.5, %v1752_v56  ;;  %vm558_vm3 = vmor %vm556_vm2, %vm557_vm1  ;;  %v563_v23 = vor.u32 1.1754944e-38, %v562_v17  ;;  %v639_v2 = vadd.f32 0.2548296, %v631_v13 }
 0x1e6   :  { %v649_v33 = vmul.f32 %v641_v21, %v1832_v47  ;;  %v1374_v47 = vld [vmem:[#allocation10 + $0x10] sm:$0xff]  ;;  %v559_v29 = vsel %vm558_vm3, %v1874_v28, %v555_v22  ;;  %vm561_vm4 = vcmp.eq.f32.partialorder %v560_v20, 8.507059e+37  ;;  %v624_v15 = vadd.f32 -0.28449672, %v616_v11  ;;  %1051 = vmatpush.bf16.msrb.mxu3 %v1399_v63 }
 0x1e7   :  { %v650_v60 = vmul.f32 %v642_v49, %v1840_v9  ;;  %1010 = vmatpush.bf16.msrb.mxu0 %v1374_v47  ;;  %v1913_v62 = vsel %vm561_vm4, %v563_v23, %v559_v29  ;;  %v659_v56 = vsub.f32 0.0, %v1828_v48  ;;  %v1373_v9 = vld [vmem:[#allocation10 + $0x8] sm:$0xff]  ;;  %v725_v4 = vadd.f32 1.0, %v717_v41  ;;  %v1390_v21 = vld [vmem:[#allocation10 + $0x90] sm:$0xff]  ;;  %1025 = vmatpush.bf16.msrb.mxu1 %v1381_v46 }
 0x1e8   :  { %v689_v54 = vmul.f32 %v1445_v45, %v649_v33  ;;  %v718_v50 = vsel %vm702_vm0, %v694_v7, %v710_v53  ;;  %v587_v28 = vmul.f32 1.0614054, %v1913_v62  ;;  %vm705_vm5 = vcmp.ge.f32.partialorder %v1757_v1, 0.0  ;;  %1038 = vmatpush.bf16.msrb.mxu2 %v1390_v21 }
 0x1e9   :  { %v690_v24 = vmul.f32 %v1449_v55, %v650_v60  ;;  %v1451_v18 = vpop.eup %1450  ;;  %v426_v19 = vmul.f32 0.5, %v1754_v59  ;;  %vm706_vm6 = vcmp.ge.f32.partialorder %v1760_v5, 0.0  ;;  %v647_v26 = vmul.f32 %v639_v2, %v1800_v58  ;;  %v1372_v59 = vld [vmem:[#allocation10] sm:$0xff] }
 0x1ea   :  { %v697_v3 = vsub.f32 1.0, %v689_v54  ;;  %v595_v36 = vadd.f32 -1.4531521, %v587_v28  ;;  %v567_v25 = vmul.f32 %v1451_v18, %v1891_v8  ;;  %v726_v7 = vadd.f32 1.0, %v718_v50  ;;  %1052 = vmatpush.bf16.msrb.mxu3 %v1398_v30  ;;  %v1396_v60 = vld [vmem:[#allocation10 + $0xc0] sm:$0xff] }
 0x1eb   :  { %v698_v13 = vsub.f32 1.0, %v690_v24  ;;  %1011 = vmatpush.bf16.msrb.mxu0 %v1373_v9  ;;  %v667_v1 = vmul.f32 %v659_v56, %v1828_v48  ;;  %v733_v33 = vmul.f32 %v725_v4, %v1858_v44  ;;  %v632_v42 = vmul.f32 %v624_v15, %v1814_v16  ;;  %v1389_v48 = vld [vmem:[#allocation10 + $0x88] sm:$0xff]  ;;  %1026 = vmatpush.bf16.msrb.mxu1 %v1380_v40 }
 0x1ec   :  { %v713_v14 = vsub.f32 0.0, %v697_v3  ;;  %v603_v58 = vmul.f32 %v595_v36, %v1913_v62  ;;  %v568_v20 = vsub.f32 1.0, %v567_v25  ;;  %v575_v49 = vand.u32 2147483647, %v1891_v8  ;;  %1039 = vmatpush.bf16.msrb.mxu2 %v1389_v48 }
 0x1ed   :  { %v714_v37 = vsub.f32 0.0, %v698_v13  ;;  %v577_v47 = vand.u32 2147483648, %v1891_v8  ;;  %vm572_vm7 = vweird.f32 %v1451_v18  ;;  %v734_v44 = vmul.f32 %v726_v7, %v1864_v43 }
 0x1ee   :  { %v721_v31 = vsel %vm705_vm5, %v697_v3, %v713_v14  ;;  %v611_v54 = vadd.f32 1.4214138, %v603_v58  ;;  %v569_v22 = vmul.f32 %v1451_v18, %v568_v20  ;;  %v687_v55 = vmul.f32 %v1902_v52, %v647_v26  ;;  %1053 = vmatpush.bf16.msrb.mxu3 %v1397_v12 }
 0x1ef   :  { %v729_v17 = vadd.f32 1.0, %v721_v31  ;;  %v722_v11 = vsel %vm706_vm6, %v698_v13, %v714_v37  ;;  %1012 = vmatpush.bf16.msrb.mxu0 %v1372_v59  ;;  %v681_v41 = vmul.f32 1.442695, %v667_v1  ;;  %vm571_vm8 = vweird.f32 %v1891_v8 }
 0x1f0   :  { %v730_v53 = vadd.f32 1.0, %v722_v11  ;;  %v619_v61 = vmul.f32 %v611_v54, %v1913_v62  ;;  %v570_v63 = vadd.f32 %v1451_v18, %v569_v22  ;;  %v675_v2 = vmul.f32 1.442695, %v1899_v27  ;;  %vm573_vm9 = vmor %vm571_vm8, %vm572_vm7 }
 0x1f1   :  { %v737_v45 = vmul.f32 %v729_v17, %v425_v57  ;;  %v1388_v57 = vld [vmem:[#allocation10 + $0x80] sm:$0xff]  ;;  %v578_v3 = vor.u32 1.1754944e-38, %v577_v47  ;;  %vm576_vm10 = vcmp.eq.f32.partialorder %v575_v49, 8.507059e+37  ;;  %1452 = vpow2.f32 %v681_v41 }
 0x1f2   :  { %v738_v23 = vmul.f32 %v730_v53, %v426_v19  ;;  %v627_v43 = vadd.f32 -0.28449672, %v619_v61  ;;  %v574_v52 = vsel %vm573_vm9, %v1451_v18, %v570_v63  ;;  %v660_v24 = vsub.f32 0.0, %v1879_v0  ;;  %1040 = vmatpush.bf16.msrb.mxu2 %v1388_v57  ;;  %1054 = vmatpush.bf16.msrb.mxu3 %v1396_v60 }
 0x1f3   :  { %v741_v5 = vpack.c.bf16 %v737_v45, %v733_v33  ;;  %v579_v15 = vsel %vm576_vm10, %v578_v3, %v574_v52  ;;  %v695_v56 = vsub.f32 1.0, %v687_v55  ;;  %v640_v9 = vadd.f32 0.2548296, %v632_v42 }
 0x1f4   :  { %v742_v29 = vpack.c.bf16 %v738_v23, %v734_v44  ;;  %v635_v8 = vmul.f32 %v627_v43, %v1913_v62  ;;  %v588_v46 = vmul.f32 1.0614054, %v579_v15  ;;  %1454 = vpow2.f32 %v675_v2 }
 0x1f5   :  { %1013 = vmatmul.bf16.vlgmr.msrb.gmra.mxu0 %v741_v5  ;;  %v668_v50 = vmul.f32 %v660_v24, %v1879_v0  ;;  %v711_v14 = vsub.f32 0.0, %v695_v56  ;;  %v648_v28 = vmul.f32 %v640_v9, %v1814_v16  ;;  %vm703_vm11 = vcmp.ge.f32.partialorder %v1733_v38, 0.0 }
 0x1f6   :  { %1027 = vmatmul.bf16.vlgmr.msrb.gmra.mxu1 %v742_v29  ;;  %v643_v27 = vadd.f32 0.2548296, %v635_v8  ;;  %v596_v4 = vadd.f32 -1.4531521, %v588_v46  ;;  %vm707_vm12 = vcmp.ge.f32.partialorder %v1822_v32, 0.0  ;;  %v423_v40 = vmul.f32 0.5, %v1726_v34 }
 0x1f7   :  { %v1453_v13 = vpop.eup %1452  ;;  %v683_v31 = vmul.f32 1.442695, %v668_v50  ;;  %v719_v36 = vsel %vm703_vm11, %v695_v56, %v711_v14  ;;  %v427_v33 = vmul.f32 0.5, %v1811_v10  ;;  %vm704_vm13 = vcmp.ge.f32.partialorder %v1736_v39, 0.0  ;;  %v1419_v39 = vld [vmem:[%s1966_s6] ss:$0 sm:$0xff] }
 0x1f8   :  { %v651_v18 = vmul.f32 %v643_v27, %v1913_v62  ;;  %v604_v19 = vmul.f32 %v596_v4, %v579_v15  ;;  %v727_v0 = vadd.f32 1.0, %v719_v36  ;;  %vm708_vm14 = vcmp.ge.f32.partialorder %v1869_v51, 0.0  ;;  %s1069_s6 = sshll.u32 %s1967_s7, 4  ;;  %s1070_s6 = int_to_ptr.hbm [resolvable:$true] %s1069_s6 }
 0x1f9   :  { %1456 = vpow2.f32 %v683_v31  ;;  %v424_v10 = vmul.f32 0.5, %v1730_v35  ;;  %v428_v22 = vmul.f32 0.5, %v1853_v6 }
 0x1fa   :  { %v691_v21 = vmul.f32 %v1453_v13, %v651_v18  ;;  %v612_v30 = vadd.f32 1.4214138, %v604_v19  ;;  %v1455_v26 = vpop.eup %1454  ;;  %v735_v58 = vmul.f32 %v727_v0, %v423_v40 }
 0x1fb   :  { %v688_v25 = vmul.f32 %v1455_v26, %v648_v28 }
 0x1fc   :  { %v699_v7 = vsub.f32 1.0, %v691_v21  ;;  %v620_v17 = vmul.f32 %v612_v30, %v579_v15 }
 0x1fd   :  { %v696_v16 = vsub.f32 1.0, %v688_v25 }
 0x1fe   :  { %v715_v37 = vsub.f32 0.0, %v699_v7  ;;  %v628_v1 = vadd.f32 -0.28449672, %v620_v17 }
 0x1ff   :  { %v712_v45 = vsub.f32 0.0, %v696_v16  ;;  %v1457_v49 = vpop.eup %1456 }
 0x200   :  { %v723_v62 = vsel %vm707_vm12, %v699_v7, %v715_v37  ;;  %v636_v59 = vmul.f32 %v628_v1, %v579_v15 }
 0x201   :  { %v731_v42 = vadd.f32 1.0, %v723_v62  ;;  %v720_v32 = vsel %vm704_vm13, %v696_v16, %v712_v45 }
 0x202   :  { %v644_v38 = vadd.f32 0.2548296, %v636_v59  ;;  %v728_v54 = vadd.f32 1.0, %v720_v32 }
 0x203   :  { %v739_v20 = vmul.f32 %v731_v42, %v427_v33 }
 0x204   :  { %v652_v11 = vmul.f32 %v644_v38, %v579_v15  ;;  %v736_v55 = vmul.f32 %v728_v54, %v424_v10 }
 0x205   :  { %v743_v47 = vpack.c.bf16 %v739_v20, %v735_v58 }
 0x206   :  { %v692_v48 = vmul.f32 %v1457_v49, %v652_v11 }
 0x207   :  { %1041 = vmatmul.bf16.vlgmr.msrb.gmra.mxu2 %v743_v47 }
 0x208   :  { %v700_v12 = vsub.f32 1.0, %v692_v48 }
 0x20a   :  { %v716_v53 = vsub.f32 0.0, %v700_v12 }
 0x20c   :  { %v724_v34 = vsel %vm708_vm14, %v700_v12, %v716_v53 }
 0x20d   :  { %v732_v44 = vadd.f32 1.0, %v724_v34 }
 0x20f   :  { %v740_v41 = vmul.f32 %v732_v44, %v428_v22 }
 0x211   :  { %v744_v5 = vpack.c.bf16 %v740_v41, %v736_v55 }
 0x213   :  { %1055 = vmatmul.bf16.vlgmr.msrb.gmra.mxu3 %v744_v5 }
 0x272   :  { %v1014_v57 = vpop.f32.mrf.mxu0 }
 0x273   :  { %v1015_v60 = vadd.f32 %v1419_v39, %v1014_v57  ;;  %v1028_v23 = vpop.f32.mrf.mxu1 }
 0x275   :  { %v1029_v63 = vadd.f32 %v1028_v23, %v1015_v60 }
 0x27a   :  { %v1016_v51 = vpop.f32.mrf.mxu0 }
 0x27b   :  { %v1017_v3 = vadd.f32 %v1419_v39, %v1016_v51  ;;  %v1030_v6 = vpop.f32.mrf.mxu1 }
 0x27d   :  { %v1031_v29 = vadd.f32 %v1030_v6, %v1017_v3 }
 0x28a   :  { %v1042_v61 = vpop.f32.mrf.mxu2 }
 0x28b   :  { %v1043_v2 = vadd.f32 %v1042_v61, %v1029_v63 }
 0x292   :  { %v1044_v52 = vpop.f32.mrf.mxu2 }
 0x293   :  { %v1045_v15 = vadd.f32 %v1044_v52, %v1031_v29 }
 0x296   :  { %v1056_v35 = vpop.f32.mrf.mxu3 }
 0x297   :  { %v1057_v43 = vadd.f32 %v1056_v35, %v1043_v2 }
 0x299   :  { %1061 = vst [vmem:[#allocation11] sm:$0xff] %v1057_v43 }
 0x29e   :  { %v1058_v24 = vpop.f32.mrf.mxu3 }
 0x29f   :  { %v1059_v56 = vadd.f32 %v1058_v24, %v1045_v15 }
 0x2a1   :  { %1062 = vst [vmem:[#allocation11 + $0x8] sm:$0xff] %v1059_v56 }
 0x2a2   :  { %1075 = dma.vmem_to_hbm [thread:$0]  %s1068_s8, 256, %s1070_s6, [#allocation4], %s1613_s18, %s1613_s18, %s1614_s4  }
 0x2a3   :  { %1608 = dma.done.wait [#allocation4], 256  }
 0x2a4   :  { %1609 = vsyncadd [#allocation4], 4294967040 }
 0x2a5   :  { %1080 = vsyncpa [#allocation3], 1 }
 0x2a6   :  { %1081 = vsyncpa [#allocation6], 1 }
 0x2a7   :  { %1082 = vsyncpa [#allocation9], 1 }
 0x2a8   :  { %1083 = vsyncpa [#allocation4], 1 }

</bundles_post_ra>
